<compile_context>
chip_gen: v7x
topology: tpu7x:2x2x1
jax: 0.10.0
libtpu: 0.0.40
codegen_flags: <defaults>
</compile_context>

<pallas_src>
import jax
import jax.numpy as jnp
from jax import lax
from jax.experimental import pallas as pl
from jax.experimental.pallas import tpu as pltpu

LANE = 128
ROW_ALIGN = 16      # keeps (TR,128) blocks legal for f32 (8,128) and bf16 (16,128)
EPSILON = 3.1       # poly-1 epsilon from PolyTopkLoss
TOPK_PCT = 10       # k = 10 (percent) from PolyTopkLoss
SMOOTH = 1.0        # smooth from SoftDiceLoss
MAX_TR = 2048       # rows per grid block (2048*128*4B = 1 MiB per f32 stream buffer)


def _make_kernel(rows_valid, tr, bpc, num_blocks, needs_mask, grid_padded,
                 assume_binary_gt):
    """Streamed poly1 + dice-accumulator kernel.

    Refs:
      p_ref, g_ref          : (tr, 128) input blocks (native dtype)
      poly_ref              : (tr, 128) f32 poly1 output block
      acc_pg_ref, acc_i_ref : (tr, 128) f32 grid-resident per-core accumulators
                              holding elementwise partial sums of (p+g), (p*g)
    """

    def kernel(p_ref, g_ref, poly_ref, acc_pg_ref, acc_i_ref):
        c = pl.program_id(0)          # core (parallel) axis
        i = pl.program_id(1)          # block stream (arbitrary) axis

        @pl.when(i == 0)
        def _():
            acc_pg_ref[...] = jnp.zeros_like(acc_pg_ref)
            acc_i_ref[...] = jnp.zeros_like(acc_i_ref)

        gb = c * bpc + i                        # unclamped global block id
        gbc = jnp.minimum(gb, num_blocks - 1)   # block that was actually DMA'd

        def compute(masked):
            p = p_ref[...].astype(jnp.float32)
            g = g_ref[...].astype(jnp.float32)

            if masked:
                row = lax.broadcasted_iota(jnp.int32, (tr, LANE), 0) + gbc * tr
                valid = row < rows_valid
                # Mask BEFORE the log so garbage (out-of-bounds) rows never
                # produce NaN/Inf.
                p = jnp.where(valid, p, 0.5)
                g = jnp.where(valid, g, 0.0)

            if assume_binary_gt:
                # Binary gt fast path: 1 transcendental per element.
                p_sel = jnp.where(g > 0.5, p, 1.0 - p)
                bce = -jnp.maximum(jnp.log(p_sel), -100.0)
                pt = p_sel                       # == exp(-bce) up to the clamp
            else:
                # Exact soft-label path (BCELoss clamps log at -100).
                logp = jnp.maximum(jnp.log(p), -100.0)
                log1mp = jnp.maximum(jnp.log(1.0 - p), -100.0)
                bce = -(g * logp + (1.0 - g) * log1mp)
                pt = jnp.exp(-bce)

            poly_ref[...] = bce + (1.0 - pt) * EPSILON   # OOB rows are clipped

            pg = p + g
            inter = p * g
            if masked:
                pg = jnp.where(valid, pg, 0.0)
                inter = jnp.where(valid, inter, 0.0)

            def accumulate():
                acc_pg_ref[...] += pg
                acc_i_ref[...] += inter

            if grid_padded:
                # Grid-padding duplicate steps recompute the clamped block so
                # the poly writeback stays correct, but must not double-count
                # the dice sums.
                pl.when(gb < num_blocks)(accumulate)
            else:
                accumulate()

        if needs_mask:
            is_tail = gbc == num_blocks - 1
            pl.when(jnp.logical_not(is_tail))(lambda: compute(False))
            pl.when(is_tail)(lambda: compute(True))
        else:
            compute(False)

    return kernel


def dice_polytopk(preds, gt_masks, *, assume_binary_gt=True, max_tr=MAX_TR):
    """Pallas implementation of DicepolyTopk.forward(preds, gt_masks)."""
    flat_p = preds.reshape(-1)
    flat_g = gt_masks.reshape(-1)
    n = flat_p.shape[0]

    rows_bulk = n // LANE
    tail_len = n - rows_bulk * LANE

    sum_pg = jnp.float32(0.0)
    sum_i = jnp.float32(0.0)
    poly_bulk = None

    if rows_bulk > 0:
        p2 = flat_p[: rows_bulk * LANE].reshape(rows_bulk, LANE)
        g2 = flat_g[: rows_bulk * LANE].reshape(rows_bulk, LANE)

        max_tr = max(ROW_ALIGN, (max_tr // ROW_ALIGN) * ROW_ALIGN)
        tr = min(max_tr, -(-rows_bulk // ROW_ALIGN) * ROW_ALIGN)
        num_blocks = -(-rows_bulk // tr)
        # 2-way split of the stream for megacore chips; free on 1-TC chips.
        ncores = 2 if num_blocks >= 2 else 1
        bpc = -(-num_blocks // ncores)
        grid_padded = ncores * bpc != num_blocks
        needs_mask = num_blocks * tr != rows_bulk

        n_total = num_blocks * tr * LANE
        in_bytes = 2 * n_total * p2.dtype.itemsize
        cost = pl.CostEstimate(
            flops=12 * n_total,
            transcendentals=(1 if assume_binary_gt else 3) * n_total,
            bytes_accessed=in_bytes + n_total * 4 + 2 * ncores * tr * LANE * 4,
        )

        stream_map = lambda c, i: (jnp.minimum(c * bpc + i, num_blocks - 1), 0)
        acc_map = lambda c, i: (c, 0)

        # TODO(synk): if xprof shows exposed input DMA on v7x, bump the two
        # input BlockSpecs to pipeline_mode=pl.Buffered(3).
        poly_bulk, acc_pg, acc_i = pl.pallas_call(
            _make_kernel(rows_bulk, tr, bpc, num_blocks, needs_mask,
                         grid_padded, assume_binary_gt),
            grid=(ncores, bpc),
            out_shape=(
                jax.ShapeDtypeStruct((rows_bulk, LANE), jnp.float32),   # poly1
                jax.ShapeDtypeStruct((ncores * tr, LANE), jnp.float32),  # sum(p+g)
                jax.ShapeDtypeStruct((ncores * tr, LANE), jnp.float32),  # sum(p*g)
            ),
            in_specs=[
                pl.BlockSpec((tr, LANE), stream_map),
                pl.BlockSpec((tr, LANE), stream_map),
            ],
            out_specs=(
                pl.BlockSpec((tr, LANE), stream_map),
                pl.BlockSpec((tr, LANE), acc_map),   # grid-resident per-core acc
                pl.BlockSpec((tr, LANE), acc_map),   # grid-resident per-core acc
            ),
            compiler_params=pltpu.CompilerParams(
                dimension_semantics=("parallel", "arbitrary"),
                vmem_limit_bytes=32 * 1024 * 1024,
            ),
            cost_estimate=cost,
        )(p2, g2)

        sum_pg = jnp.sum(acc_pg)
        sum_i = jnp.sum(acc_i)

    # <128-element ragged tail finished in plain JAX (avoids a full-array
    # pad/concatenate pass over HBM for ragged sizes).
    tail_poly = None
    if tail_len:
        tp = flat_p[rows_bulk * LANE:].astype(jnp.float32)
        tg = flat_g[rows_bulk * LANE:].astype(jnp.float32)
        sum_pg = sum_pg + jnp.sum(tp) + jnp.sum(tg)
        sum_i = sum_i + jnp.sum(tp * tg)
        bce = -(tg * jnp.maximum(jnp.log(tp), -100.0)
                + (1.0 - tg) * jnp.maximum(jnp.log(1.0 - tp), -100.0))
        tail_poly = bce + (1.0 - jnp.exp(-bce)) * EPSILON

    # SoftDiceLoss (tiny final reductions over the (ncores*tr,128) accumulators).
    dice_loss = 1.0 - (2.0 * sum_i + SMOOTH) / (sum_pg + SMOOTH)

    # PolyTopkLoss: mean of the top int(N * k / 100) poly1 values.
    k = int(n * TOPK_PCT / 100)
    # TODO(synk): exact top-10% kept as lax.top_k; a streamed in-kernel
    # histogram/threshold pass (or lax.approx_max_k) would remove the sort and
    # the poly HBM re-read from the critical path for very large maps.
    if k == 0:
        polytopk = jnp.float32(float("nan"))   # torch: mean of an empty top-k
    else:
        if poly_bulk is not None:
            kb = min(k, rows_bulk * LANE)
            cand = lax.top_k(poly_bulk.reshape(-1), kb)[0]
            if tail_poly is not None:
                cand = jnp.concatenate([cand, tail_poly])
        else:
            cand = tail_poly
        topk_vals = cand if cand.shape[0] == k else lax.top_k(cand, k)[0]
        polytopk = jnp.mean(topk_vals)

    return dice_loss + polytopk


def _reference(preds, gt_masks):
    """Pure-JAX reference mirroring the PyTorch module."""
    p = preds.reshape(-1).astype(jnp.float32)
    g = gt_masks.reshape(-1).astype(jnp.float32)
    inter = jnp.sum(p * g)
    dice = 1.0 - (2.0 * inter + SMOOTH) / (jnp.sum(p) + jnp.sum(g) + SMOOTH)
    bce = -(g * jnp.maximum(jnp.log(p), -100.0)
            + (1.0 - g) * jnp.maximum(jnp.log(1.0 - p), -100.0))
    pt = jnp.exp(-bce)
    poly1 = bce + (1.0 - pt) * EPSILON
    k = int(p.size * TOPK_PCT / 100)
    top = jax.lax.top_k(poly1, k)[0]
    return dice + jnp.mean(top)


if __name__ == "__main__":
    key = jax.random.PRNGKey(0)
    k1, k2, k3, k4, k5, k6 = jax.random.split(key, 6)

    # Case 1: NCHW, lane-aligned size (batch=2, channels=4, spatial=16x16).
    shape = (2, 4, 16, 16)
    preds = jax.nn.sigmoid(jax.random.normal(k1, shape, dtype=jnp.float32))
    gt_masks = (jax.random.uniform(k2, shape) > 0.7).astype(jnp.float32)
    out = jax.block_until_ready(dice_polytopk(preds, gt_masks))
    ref = jax.block_until_ready(_reference(preds, gt_masks))
    assert jnp.allclose(out, ref, rtol=1e-5, atol=1e-5), (out, ref)

    # Case 2: ragged size (exercises the JAX tail path + masked kernel block).
    shape2 = (1, 1, 10, 13)
    preds2 = jax.nn.sigmoid(jax.random.normal(k3, shape2, dtype=jnp.float32))
    gt_masks2 = (jax.random.uniform(k4, shape2) > 0.7).astype(jnp.float32)
    out2 = jax.block_until_ready(dice_polytopk(preds2, gt_masks2))
    ref2 = jax.block_until_ready(_reference(preds2, gt_masks2))
    assert jnp.allclose(out2, ref2, rtol=1e-5, atol=1e-5), (out2, ref2)

    # Case 3: bf16 inputs + small max_tr to exercise the multi-block stream,
    # the 2-way "parallel" core split, grid padding and the masked tail block.
    shape3 = (1, 1, 48, 112)
    preds3 = jax.nn.sigmoid(jax.random.normal(k5, shape3, dtype=jnp.float32)
                            ).astype(jnp.bfloat16)
    gt_masks3 = (jax.random.uniform(k6, shape3) > 0.7).astype(jnp.bfloat16)
    out3 = jax.block_until_ready(dice_polytopk(preds3, gt_masks3, max_tr=16))
    ref3 = jax.block_until_ready(_reference(preds3, gt_masks3))
    assert jnp.allclose(out3, ref3, rtol=1e-5, atol=1e-5), (out3, ref3)

    print("KERNEL_OK")
</pallas_src>

<mosaic_0001>
module attributes {stable_mosaic.version = 11 : i64} {
  func.func @kernel(%arg0: i32, %arg1: i32, %arg2: memref<16x128xf32, #tpu.memory_space<vmem>>, %arg3: memref<16x128xf32, #tpu.memory_space<vmem>>, %arg4: memref<16x128xf32, #tpu.memory_space<vmem>>, %arg5: memref<16x128xf32, #tpu.memory_space<vmem>>, %arg6: memref<16x128xf32, #tpu.memory_space<vmem>>) attributes {dimension_semantics = [#tpu.dimension_semantics<parallel>, #tpu.dimension_semantics<arbitrary>], iteration_bounds = array<i64: 1, 1>, scalar_prefetch = 0 : i64, scratch_operands = 0 : i64, tpu.core_type = #tpu.core_type<tc>, window_params = [{transform_indices = @transform_0, window_bounds = array<i64: 16, 128>}, {transform_indices = @transform_1, window_bounds = array<i64: 16, 128>}, {transform_indices = @transform_2, window_bounds = array<i64: 16, 128>}, {transform_indices = @transform_3, window_bounds = array<i64: 16, 128>}, {transform_indices = @transform_4, window_bounds = array<i64: 16, 128>}]} {
    %c0_i32 = arith.constant 0 : i32
    %0 = arith.cmpi eq, %arg1, %c0_i32 : i32
    %1 = arith.extui %0 : i1 to i32
    %c0_i32_0 = arith.constant 0 : i32
    %2 = arith.cmpi ne, %1, %c0_i32_0 : i32
    scf.if %2 {
      %cst_19 = arith.constant 0.000000e+00 : f32
      %29 = vector.broadcast %cst_19 : f32 to vector<16x128xf32>
      %c0_20 = arith.constant 0 : index
      %c0_21 = arith.constant 0 : index
      %30 = vector.load %arg5[%c0_20, %c0_21] : memref<16x128xf32, #tpu.memory_space<vmem>>, vector<16x128xf32>
      tpu.vector_store %arg5[%c0_20, %c0_21], %29 {strides = array<i32>} : memref<16x128xf32, #tpu.memory_space<vmem>>, vector<16x128xf32>,
      %cst_22 = arith.constant 0.000000e+00 : f32
      %31 = vector.broadcast %cst_22 : f32 to vector<16x128xf32>
      %c0_23 = arith.constant 0 : index
      %c0_24 = arith.constant 0 : index
      %32 = vector.load %arg6[%c0_23, %c0_24] : memref<16x128xf32, #tpu.memory_space<vmem>>, vector<16x128xf32>
      tpu.vector_store %arg6[%c0_23, %c0_24], %31 {strides = array<i32>} : memref<16x128xf32, #tpu.memory_space<vmem>>, vector<16x128xf32>,
    } else {
    }
    %c0 = arith.constant 0 : index
    %c0_1 = arith.constant 0 : index
    %3 = vector.load %arg2[%c0, %c0_1] : memref<16x128xf32, #tpu.memory_space<vmem>>, vector<16x128xf32>
    %c0_2 = arith.constant 0 : index
    %c0_3 = arith.constant 0 : index
    %4 = vector.load %arg3[%c0_2, %c0_3] : memref<16x128xf32, #tpu.memory_space<vmem>>, vector<16x128xf32>
    %cst = arith.constant 5.000000e-01 : f32
    %5 = vector.broadcast %cst : f32 to vector<16x128xf32>
    %6 = arith.cmpf ogt, %4, %5 : vector<16x128xf32>
    %cst_4 = arith.constant 1.000000e+00 : f32
    %7 = vector.broadcast %cst_4 : f32 to vector<16x128xf32>
    %8 = arith.subf %7, %3 : vector<16x128xf32>
    %9 = arith.select %6, %3, %8 : vector<16x128xi1>, vector<16x128xf32>
    %10 = math.log %9 : vector<16x128xf32>
    %cst_5 = arith.constant -1.000000e+02 : f32
    %11 = vector.broadcast %cst_5 : f32 to vector<16x128xf32>
    %12 = arith.maximumf %10, %11 : vector<16x128xf32>
    %cst_6 = arith.constant 0.000000e+00 : f32
    %13 = vector.broadcast %cst_6 : f32 to vector<16x128xf32>
    %14 = arith.subf %13, %12 : vector<16x128xf32>
    %cst_7 = arith.constant 1.000000e+00 : f32
    %15 = vector.broadcast %cst_7 : f32 to vector<16x128xf32>
    %16 = arith.subf %15, %9 : vector<16x128xf32>
    %cst_8 = arith.constant 3.100000e+00 : f32
    %17 = vector.broadcast %cst_8 : f32 to vector<16x128xf32>
    %18 = arith.mulf %16, %17 : vector<16x128xf32>
    %19 = arith.addf %14, %18 : vector<16x128xf32>
    %c0_9 = arith.constant 0 : index
    %c0_10 = arith.constant 0 : index
    %20 = vector.load %arg4[%c0_9, %c0_10] : memref<16x128xf32, #tpu.memory_space<vmem>>, vector<16x128xf32>
    tpu.vector_store %arg4[%c0_9, %c0_10], %19 {strides = array<i32>} : memref<16x128xf32, #tpu.memory_space<vmem>>, vector<16x128xf32>,
    %21 = arith.addf %3, %4 : vector<16x128xf32>
    %22 = arith.mulf %3, %4 : vector<16x128xf32>
    %c0_11 = arith.constant 0 : index
    %c0_12 = arith.constant 0 : index
    %23 = vector.load %arg5[%c0_11, %c0_12] : memref<16x128xf32, #tpu.memory_space<vmem>>, vector<16x128xf32>
    %24 = arith.addf %23, %21 : vector<16x128xf32>
    %c0_13 = arith.constant 0 : index
    %c0_14 = arith.constant 0 : index
    %25 = vector.load %arg5[%c0_13, %c0_14] : memref<16x128xf32, #tpu.memory_space<vmem>>, vector<16x128xf32>
    tpu.vector_store %arg5[%c0_13, %c0_14], %24 {strides = array<i32>} : memref<16x128xf32, #tpu.memory_space<vmem>>, vector<16x128xf32>,
    %c0_15 = arith.constant 0 : index
    %c0_16 = arith.constant 0 : index
    %26 = vector.load %arg6[%c0_15, %c0_16] : memref<16x128xf32, #tpu.memory_space<vmem>>, vector<16x128xf32>
    %27 = arith.addf %26, %22 : vector<16x128xf32>
    %c0_17 = arith.constant 0 : index
    %c0_18 = arith.constant 0 : index
    %28 = vector.load %arg6[%c0_17, %c0_18] : memref<16x128xf32, #tpu.memory_space<vmem>>, vector<16x128xf32>
    tpu.vector_store %arg6[%c0_17, %c0_18], %27 {strides = array<i32>} : memref<16x128xf32, #tpu.memory_space<vmem>>, vector<16x128xf32>,
    return
  }
  func.func @transform_0(%arg0: i32, %arg1: i32) -> (i32, i32) {
    %c1_i32 = arith.constant 1 : i32
    %0 = arith.muli %arg0, %c1_i32 : i32
    %1 = arith.addi %0, %arg1 : i32
    %c0_i32 = arith.constant 0 : i32
    %2 = arith.minsi %1, %c0_i32 : i32
    %c0_i32_0 = arith.constant 0 : i32
    %c0_i32_1 = arith.constant 0 : i32
    return %2, %c0_i32_0 : i32, i32
  }
  func.func @transform_1(%arg0: i32, %arg1: i32) -> (i32, i32) {
    %c1_i32 = arith.constant 1 : i32
    %0 = arith.muli %arg0, %c1_i32 : i32
    %1 = arith.addi %0, %arg1 : i32
    %c0_i32 = arith.constant 0 : i32
    %2 = arith.minsi %1, %c0_i32 : i32
    %c0_i32_0 = arith.constant 0 : i32
    %c0_i32_1 = arith.constant 0 : i32
    return %2, %c0_i32_0 : i32, i32
  }
  func.func @transform_2(%arg0: i32, %arg1: i32) -> (i32, i32) {
    %c1_i32 = arith.constant 1 : i32
    %0 = arith.muli %arg0, %c1_i32 : i32
    %1 = arith.addi %0, %arg1 : i32
    %c0_i32 = arith.constant 0 : i32
    %2 = arith.minsi %1, %c0_i32 : i32
    %c0_i32_0 = arith.constant 0 : i32
    %c0_i32_1 = arith.constant 0 : i32
    return %2, %c0_i32_0 : i32, i32
  }
  func.func @transform_3(%arg0: i32, %arg1: i32) -> (i32, i32) {
    %c0_i32 = arith.constant 0 : i32
    %c0_i32_0 = arith.constant 0 : i32
    return %arg0, %c0_i32 : i32, i32
  }
  func.func @transform_4(%arg0: i32, %arg1: i32) -> (i32, i32) {
    %c0_i32 = arith.constant 0 : i32
    %c0_i32_0 = arith.constant 0 : i32
    return %arg0, %c0_i32 : i32, i32
  }
}

</mosaic_0001>

<bundles_post_ra>
// kernel: tpu_custom_call.1
= control target key start
LH: loop header
LB: loop body
LE: loop exit
PB: predicated region body
PF: predicated region fallthrough
CT: control target
= control target key end

     0   :  { %10 = vsyncpa [#allocation3], 0  ;;  %s423_s0 = inlined_call_operand.hbm [shape: f32[16,128], index: 0, kind: input, shape index: {}]   ;;  %s424_s1 = inlined_call_operand.hbm [shape: f32[16,128], index: 1, kind: input, shape index: {}]   ;;  %s425_s2 = inlined_call_operand.hbm [shape: f32[16,128], index: 2, kind: output, shape index: {0}]   ;;  %s426_s3 = inlined_call_operand.hbm [shape: f32[16,128], index: 3, kind: output, shape index: {1}]   ;;  %s427_s4 = inlined_call_operand.hbm [shape: f32[16,128], index: 4, kind: output, shape index: {2}]  }
   0x1   :  { %11 = vsyncpa [#allocation6], 0 }
   0x2   :  { %12 = vsyncpa [#allocation4], 0 }
   0x3   :  { %13 = vsyncpa [#allocation9], 0  ;;  %s309_s15 = smov [#allocation2]   ;;  %s191_s19 = scalar_lea.hbm %s423_s0, 256 }
   0x4   :  { %s25_s16 = sshll.u32 %s309_s15, 4  ;;  %p192_p0 = scmp.ne.s32.totalorder %s423_s0, %s191_s19  ;;  %s26_s16 = int_to_ptr.vmem [resolvable:$true] %s25_s16 }
   0x5   :  { %p195_p1 = scmp.lt.u32.totalorder %s191_s19, %s423_s0 }
   0x7   :  { %p197_p2 = pnand %p195_p1, %p192_p0 }
   0x9   :  { %200 = shalt.err (!%p197_p2)
}
   0xa   :  { %s201_s24 = scalar_lea.vmem %s26_s16, 256  ;;  %p206_p4 = scmp.lt.s32.totalorder %s26_s16, %s26_s16 }
   0xb   :  { %p202_p3 = scmp.ne.s32.totalorder %s26_s16, %s201_s24  ;;  %p207_p5 = scmp.lt.s32.totalorder %s201_s24, %s201_s24 }
   0xd   :  { %p208_p6 = por %p207_p5, %p206_p4 }
   0xf   :  { %p209_p7 = pnand %p208_p6, %p202_p3 }
  0x11   :  { %212 = shalt.err (!%p209_p7)
}
  0x12   :  { %s310_s25 = smov 128   ;;  %s311_s26 = smov 8  }
  0x13   :  { %31 = dma.hbm_to_vmem [thread:$0]  %s423_s0, 256, %s26_s16, [#allocation3], %s310_s25, %s310_s25, %s311_s26  }
  0x14   :  { %s312_s29 = smov [#allocation5]   ;;  %s213_s7 = scalar_lea.hbm %s424_s1, 256 }
  0x15   :  { %s43_s30 = sshll.u32 %s312_s29, 4  ;;  %p214_p8 = scmp.ne.s32.totalorder %s424_s1, %s213_s7  ;;  %s44_s30 = int_to_ptr.vmem [resolvable:$true] %s43_s30 }
  0x16   :  { %p217_p9 = scmp.lt.u32.totalorder %s213_s7, %s424_s1 }
  0x18   :  { %p219_p10 = pnand %p217_p9, %p214_p8 }
  0x1a   :  { %222 = shalt.err (!%p219_p10)
}
  0x1b   :  { %s223_s12 = scalar_lea.vmem %s44_s30, 256  ;;  %p228_p12 = scmp.lt.s32.totalorder %s44_s30, %s44_s30 }
  0x1c   :  { %p224_p11 = scmp.ne.s32.totalorder %s44_s30, %s223_s12  ;;  %p229_p13 = scmp.lt.s32.totalorder %s223_s12, %s223_s12 }
  0x1e   :  { %p230_p0 = por %p229_p13, %p228_p12 }
  0x20   :  { %p231_p1 = pnand %p230_p0, %p224_p11 }
  0x22   :  { %234 = shalt.err (!%p231_p1)
}
  0x23   :  { %49 = dma.hbm_to_vmem [thread:$0]  %s424_s1, 256, %s44_s30, [#allocation6], %s310_s25, %s310_s25, %s311_s26  }
  0x24   :  { %301 = dma.done.wait [#allocation3], 256  }
  0x25   :  { %302 = vsyncadd [#allocation3], 4294967040 }
  0x26   :  { %303 = dma.done.wait [#allocation6], 256  }
  0x27   :  { %304 = vsyncadd [#allocation6], 4294967040  ;;  %v76_v0 = vld [vmem:[#allocation2] sm:$0xff]  ;;  %v78_v1 = vld [vmem:[#allocation5] sm:$0xff]  ;;  %s313_s14 = smov [#allocation8]   ;;  %s314_s16 = smov [#allocation10]  }
  0x28   :  { %v77_v2 = vld [vmem:[#allocation2 + $0x8] sm:$0xff]  ;;  %v102_v3 = vadd.f32 %v78_v1, %v76_v0  ;;  %v79_v4 = vld [vmem:[#allocation5 + $0x8] sm:$0xff]  ;;  %vm80_vm0 = vcmp.gt.f32.partialorder %v78_v1, 0.5  ;;  %v82_v5 = vsub.f32 1.0, %v76_v0  ;;  %s141_s15 = sshll.u32 %s313_s14, 4  ;;  %v104_v8 = vmul.f32 %v78_v1, %v76_v0  ;;  %s153_s1 = sshll.u32 %s314_s16, 4  ;;  %s142_s15 = int_to_ptr.vmem [resolvable:$true] %s141_s15  ;;  %s371_s1 = int_to_ptr.vmem [resolvable:$true] %s153_s1 }
  0x29   :  { %v83_v6 = vsub.f32 1.0, %v77_v2  ;;  %v103_v7 = vadd.f32 %v79_v4, %v77_v2  ;;  %vm81_vm1 = vcmp.gt.f32.partialorder %v79_v4, 0.5  ;;  %v105_v9 = vmul.f32 %v79_v4, %v77_v2  ;;  %s235_s17 = scalar_lea.vmem %s142_s15, 256  ;;  %p240_p3 = scmp.lt.s32.totalorder %s142_s15, %s142_s15 }
  0x2a   :  { %v84_v10 = vsel %vm80_vm0, %v76_v0, %v82_v5  ;;  %110 = vst [vmem:[#allocation8] sm:$0xff] %v102_v3  ;;  %116 = vst [vmem:[#allocation10] sm:$0xff] %v104_v8  ;;  %p236_p2 = scmp.ne.s32.totalorder %s142_s15, %s235_s17  ;;  %p241_p4 = scmp.lt.s32.totalorder %s235_s17, %s235_s17 }
  0x2b   :  { %v85_v11 = vsel %vm81_vm1, %v77_v2, %v83_v6  ;;  %187 = vlog2.f32 %v84_v10  ;;  %111 = vst [vmem:[#allocation8 + $0x8] sm:$0xff] %v103_v7  ;;  %117 = vst [vmem:[#allocation10 + $0x8] sm:$0xff] %v105_v9 }
  0x2c   :  { %189 = vlog2.f32 %v85_v11  ;;  %p242_p5 = por %p241_p4, %p240_p3 }
  0x2e   :  { %p243_p6 = pnand %p242_p5, %p236_p2 }
  0x30   :  { %246 = shalt.err (!%p243_p6)
}
  0x31   :  { %s247_s20 = scalar_lea.hbm %s426_s3, 256 }
  0x32   :  { %p248_p7 = scmp.ne.s32.totalorder %s426_s3, %s247_s20  ;;  %p251_p8 = scmp.lt.u32.totalorder %s247_s20, %s426_s3 }
  0x34   :  { %p253_p9 = pnand %p251_p8, %p248_p7 }
  0x36   :  { %256 = shalt.err (!%p253_p9)
}
  0x37   :  { %147 = dma.vmem_to_hbm [thread:$0]  %s142_s15, 256, %s426_s3, [#allocation9], %s310_s25, %s310_s25, %s311_s26  }
  0x38   :  { %s257_s29 = scalar_lea.vmem %s371_s1, 256  ;;  %p262_p11 = scmp.lt.s32.totalorder %s371_s1, %s371_s1 }
  0x39   :  { %p258_p10 = scmp.ne.s32.totalorder %s371_s1, %s257_s29  ;;  %p263_p12 = scmp.lt.s32.totalorder %s257_s29, %s257_s29 }
  0x3b   :  { %p264_p13 = por %p263_p12, %p262_p11 }
  0x3d   :  { %p265_p0 = pnand %p264_p13, %p258_p10 }
  0x3f   :  { %268 = shalt.err (!%p265_p0)
}
  0x40   :  { %s269_s6 = scalar_lea.hbm %s427_s4, 256 }
  0x41   :  { %p270_p1 = scmp.ne.s32.totalorder %s427_s4, %s269_s6  ;;  %p273_p2 = scmp.lt.u32.totalorder %s269_s6, %s427_s4 }
  0x43   :  { %p275_p3 = pnand %p273_p2, %p270_p1 }
  0x45   :  { %278 = shalt.err (!%p275_p3)
}
  0x46   :  { %159 = dma.vmem_to_hbm [thread:$0]  %s371_s1, 256, %s427_s4, [#allocation9], %s310_s25, %s310_s25, %s311_s26   ;;  %v94_v12 = vsub.f32 1.0, %v84_v10  ;;  %v188_v13 = vpop.eup %187  ;;  %v95_v14 = vsub.f32 1.0, %v85_v11 }
  0x47   :  { %v190_v15 = vpop.eup %189  ;;  %v87_v16 = vmul.f32 0.6931472, %v188_v13  ;;  %s315_s12 = smov [#allocation7]  }
  0x48   :  { %v89_v17 = vmul.f32 0.6931472, %v190_v15  ;;  %v96_v19 = vmul.f32 3.1, %v94_v12  ;;  %v97_v21 = vmul.f32 3.1, %v95_v14 }
  0x49   :  { %v90_v18 = vmax.f32 %v87_v16, -100.0  ;;  %s129_s0 = sshll.u32 %s315_s12, 4  ;;  %s130_s0 = int_to_ptr.vmem [resolvable:$true] %s129_s0 }
  0x4a   :  { %v91_v20 = vmax.f32 %v89_v17, -100.0  ;;  %s279_s4 = scalar_lea.vmem %s130_s0, 256  ;;  %p284_p5 = scmp.lt.s32.totalorder %s130_s0, %s130_s0 }
  0x4b   :  { %v92_v22 = vsub.f32 0.0, %v90_v18  ;;  %p280_p4 = scmp.ne.s32.totalorder %s130_s0, %s279_s4  ;;  %p285_p6 = scmp.lt.s32.totalorder %s279_s4, %s279_s4 }
  0x4c   :  { %v93_v23 = vsub.f32 0.0, %v91_v20 }
  0x4d   :  { %v98_v24 = vadd.f32 %v96_v19, %v92_v22  ;;  %p286_p7 = por %p285_p6, %p284_p5 }
  0x4e   :  { %v99_v25 = vadd.f32 %v97_v21, %v93_v23 }
  0x4f   :  { %100 = vst [vmem:[#allocation7] sm:$0xff] %v98_v24  ;;  %p287_p8 = pnand %p286_p7, %p280_p4 }
  0x50   :  { %101 = vst [vmem:[#allocation7 + $0x8] sm:$0xff] %v99_v25 }
  0x51   :  { %290 = shalt.err (!%p287_p8)
}
  0x52   :  { %s291_s15 = scalar_lea.hbm %s425_s2, 256 }
  0x53   :  { %p292_p9 = scmp.ne.s32.totalorder %s425_s2, %s291_s15  ;;  %p295_p10 = scmp.lt.u32.totalorder %s291_s15, %s425_s2 }
  0x55   :  { %p297_p11 = pnand %p295_p10, %p292_p9 }
  0x57   :  { %300 = shalt.err (!%p297_p11)
}
  0x58   :  { %135 = dma.vmem_to_hbm [thread:$0]  %s130_s0, 256, %s425_s2, [#allocation4], %s310_s25, %s310_s25, %s311_s26  }
  0x59   :  { %305 = dma.done.wait [#allocation4], 256  }
  0x5a   :  { %306 = vsyncadd [#allocation4], 4294967040 }
  0x5b   :  { %307 = dma.done.wait [#allocation9], 512  }
  0x5c   :  { %308 = vsyncadd [#allocation9], 4294966784 }
  0x5d   :  { %169 = vsyncpa [#allocation3], 1 }
  0x5e   :  { %170 = vsyncpa [#allocation6], 1 }
  0x5f   :  { %171 = vsyncpa [#allocation4], 1 }
  0x60   :  { %172 = vsyncpa [#allocation9], 1 }

</bundles_post_ra>
